<compile_context>
chip_gen: v7x
topology: tpu7x:2x2x1
jax: 0.10.0
libtpu: 0.0.40
codegen_flags: <defaults>
</compile_context>

<pallas_src>
import functools

import jax
import jax.numpy as jnp
from jax.experimental import pallas as pl
from jax.experimental.pallas import tpu as pltpu


def _mha_kernel(x_ref, w_qkv_ref, b_qkv_ref, w_out_ref, b_out_ref, o_ref, *,
                batch_tile, seq_len, num_heads, head_dim):
    TB, S, H, D = batch_tile, seq_len, num_heads, head_dim
    E = H * D
    R = TB * S                               # rows handled by this grid step

    cdt = w_qkv_ref.dtype                    # MXU operand dtype (bf16)

    x = x_ref[...].astype(cdt)               # (R, E)

    # ---- QKV projection: one full-width matmul (K=E, N=3E) ----------------
    # 1/sqrt(D) is already folded into the Q columns of W_qkv / b_qkv.
    qkv = jnp.dot(x, w_qkv_ref[...], preferred_element_type=jnp.float32)
    qkv = qkv + b_qkv_ref[...]               # (R, 3E) f32

    # ---- head split: static lane slices, stacked head-major ---------------
    def gather_heads(base):                  # -> (H, R, D) f32
        return jnp.stack(
            [qkv[:, base + h * D: base + (h + 1) * D] for h in range(H)],
            axis=0)

    # fold the batch tile into the head-batch dim (major-only reshapes)
    def fold(t):                             # (H, R, D) -> (H*TB, S, D)
        return t.reshape(H, TB, S, D).reshape(H * TB, S, D).astype(cdt)

    qb = fold(gather_heads(0))
    kb = fold(gather_heads(E))
    vb = fold(gather_heads(2 * E))

    # ---- attention, batched over (head, batch-elem) ------------------------
    s = jnp.einsum('bqd,bkd->bqk', qb, kb,
                   preferred_element_type=jnp.float32)        # (H*TB, S, S) f32
    m = jnp.max(s, axis=-1, keepdims=True)
    p = jnp.exp(s - m)
    denom = jnp.sum(p, axis=-1, keepdims=True)
    p = (p * pl.reciprocal(denom, approx=True)).astype(cdt)   # EUP reciprocal
    ctx = jnp.einsum('bqk,bkd->bqd', p, vb,
                     preferred_element_type=jnp.float32)      # (H*TB, S, D) f32

    # ---- head merge back to (R, E): lane concat (inverse of the split) -----
    ctx = ctx.reshape(H, TB, S, D).reshape(H, R, D)           # major-only reshape
    ctx2d = jnp.concatenate([ctx[h] for h in range(H)], axis=-1)   # (R, E)
    ctx2d = ctx2d.astype(cdt)

    # ---- output projection: single full-depth matmul (K=E, N=E_out) --------
    out = jnp.dot(ctx2d, w_out_ref[...],
                  preferred_element_type=jnp.float32)         # (R, E_out)
    out = out + b_out_ref[...]
    o_ref[...] = out.astype(o_ref.dtype)     # dense (>=128-lane) row-slab store


def _const_spec(block_shape):
    """BlockSpec for grid-invariant (constant index) operands, single-buffered."""
    index_map = lambda b: (0,) * len(block_shape)
    if hasattr(pl, "Buffered"):
        try:
            return pl.BlockSpec(block_shape, index_map,
                                pipeline_mode=pl.Buffered(1))
        except TypeError:
            pass
    return pl.BlockSpec(block_shape, index_map)


def global_self_attention(x, in_proj_weight, in_proj_bias,
                          out_proj_weight, out_proj_bias, *,
                          num_heads, batch_tile=None,
                          compute_dtype=jnp.bfloat16,
                          vmem_budget_bytes=20 * 1024 * 1024):
    """Eval-mode self-attention matching torch.nn.MultiheadAttention(batch_first=True).

    x:               (B, S, E) float32
    in_proj_weight:  (3E, E)   [Wq; Wk; Wv] torch layout
    in_proj_bias:    (3E,)
    out_proj_weight: (E, E)
    out_proj_bias:   (E,)
    """
    B, S, E = x.shape
    H = num_heads
    assert E % H == 0
    D = E // H
    scale = 1.0 / (D ** 0.5)
    bf = jnp.dtype(compute_dtype).itemsize

    # Lane-dense output: pad the out-projection columns to 128 when E < 128 so
    # the kernel's store is unmasked; the wrapper slices the padding off.
    E_out = 128 if E < 128 else E

    # ---- one-time parameter layout prep ------------------------------------
    # W_qkv: (E, 3E), columns [q | k | v]; fold 1/sqrt(D) into the Q columns.
    w_qkv_f32 = in_proj_weight.T.astype(jnp.float32)
    w_qkv_f32 = jnp.concatenate([w_qkv_f32[:, :E] * scale, w_qkv_f32[:, E:]],
                                axis=1)
    w_qkv = w_qkv_f32.astype(compute_dtype)                       # (E, 3E)
    b_qkv_f32 = in_proj_bias.astype(jnp.float32)
    b_qkv = jnp.concatenate([b_qkv_f32[:E] * scale, b_qkv_f32[E:]]
                            ).reshape(1, 3 * E)                   # (1, 3E) f32

    w_out_f32 = out_proj_weight.T.astype(jnp.float32)             # (E, E)
    b_out_f32 = out_proj_bias.astype(jnp.float32)                 # (E,)
    if E_out != E:
        w_out_f32 = jnp.pad(w_out_f32, ((0, 0), (0, E_out - E)))
        b_out_f32 = jnp.pad(b_out_f32, (0, E_out - E))
    w_out = w_out_f32.astype(compute_dtype)                       # (E, E_out)
    b_out = b_out_f32.reshape(1, E_out)                           # (1, E_out) f32

    # ---- VMEM-budget-driven batch tiling ------------------------------------
    def _step_bytes(tb):
        r = tb * S
        hb = H * tb
        slabs = 2 * r * E * 4 + 2 * r * E_out * 4        # double-buffered in/out
        weights = (E * 3 * E + E * E_out) * bf + (3 * E + E_out) * 4
        inter = (r * 3 * E * (4 + bf)                    # qkv f32 + bf16 q/k/v
                 + 3 * r * E * 4                         # head stacks (f32)
                 + hb * S * S * (4 + 4 + bf)             # scores, exp, probs
                 + r * E * (4 + bf)                      # merged ctx
                 + r * E_out * 4)                        # out f32
        return slabs + weights + inter

    if batch_tile is None:
        batch_tile = 1
        for tb in range(1, B + 1):
            if B % tb == 0 and _step_bytes(tb) <= vmem_budget_bytes:
                batch_tile = tb
    assert B % batch_tile == 0
    steps = B // batch_tile
    R = batch_tile * S
    # Sublane alignment for partial blocks; fall back to a single fat step.
    if steps > 1 and R % 8 != 0:
        batch_tile, steps, R = B, 1, B * S
    # Guard (correctness): every block must cover whole consecutive sequences.
    assert R % S == 0

    vmem_limit_bytes = int(min(48 * 1024 * 1024,
                               max(32 * 1024 * 1024, 2 * _step_bytes(batch_tile))))

    x2d = x.reshape(B * S, E)                                     # free reshape

    # Cost hint for XLA's scheduler around the custom call.
    flops = (2 * B * S * E * 3 * E          # QKV projection
             + 4 * B * H * S * S * D        # QK^T + PV
             + 2 * B * S * E * E_out)       # output projection
    transcendentals = B * H * S * S         # exp
    bytes_accessed = (x2d.size * 4 + w_qkv.size * bf + b_qkv.size * 4
                      + w_out.size * bf + b_out.size * 4
                      + B * S * E_out * 4)
    cost = pl.CostEstimate(flops=int(flops),
                           transcendentals=int(transcendentals),
                           bytes_accessed=int(bytes_accessed))

    kernel = functools.partial(_mha_kernel, batch_tile=batch_tile, seq_len=S,
                               num_heads=H, head_dim=D)

    out2d = pl.pallas_call(
        kernel,
        out_shape=jax.ShapeDtypeStruct((B * S, E_out), x.dtype),
        grid_spec=pltpu.PrefetchScalarGridSpec(
            num_scalar_prefetch=0,
            grid=(steps,),
            in_specs=[
                pl.BlockSpec((R, E), lambda b: (b, 0)),     # x row slab
                _const_spec((E, 3 * E)),                    # fused QKV weight
                _const_spec((1, 3 * E)),                    # fused QKV bias
                _const_spec((E, E_out)),                    # out-proj weight
                _const_spec((1, E_out)),                    # out-proj bias
            ],
            out_specs=pl.BlockSpec((R, E_out), lambda b: (b, 0)),
        ),
        compiler_params=pltpu.CompilerParams(
            dimension_semantics=("parallel",),
            vmem_limit_bytes=vmem_limit_bytes),
        cost_estimate=cost,
    )(x2d, w_qkv, b_qkv, w_out, b_out)

    return out2d[:, :E].reshape(B, S, E)


def _reference(x, in_proj_weight, in_proj_bias, out_proj_weight, out_proj_bias,
               num_heads):
    """Pure-JAX f32 reference mirroring torch.nn.MultiheadAttention (eval mode)."""
    B, S, E = x.shape
    H = num_heads
    D = E // H
    qkv = jnp.einsum('bse,fe->bsf', x, in_proj_weight) + in_proj_bias
    q, k, v = qkv[..., :E], qkv[..., E:2 * E], qkv[..., 2 * E:]

    def split(t):  # (B, S, E) -> (B, H, S, D)
        return t.reshape(B, S, H, D).transpose(0, 2, 1, 3)

    q, k, v = split(q), split(k), split(v)
    s = jnp.einsum('bhqd,bhkd->bhqk', q, k) / (D ** 0.5)
    p = jax.nn.softmax(s, axis=-1)
    o = jnp.einsum('bhqk,bhkd->bhqd', p, v).transpose(0, 2, 1, 3).reshape(B, S, E)
    return jnp.einsum('bse,fe->bsf', o, out_proj_weight) + out_proj_bias


if __name__ == "__main__":
    # Small shapes consistent with the module: batch=2, seq=8, embed_dim=32, heads=4.
    B, S, E, H = 2, 8, 32, 4

    key = jax.random.PRNGKey(0)
    kx, k1, k2, k3, k4 = jax.random.split(key, 5)

    x = jax.random.normal(kx, (B, S, E), jnp.float32)

    bound_in = (6.0 / (E + 3 * E)) ** 0.5
    in_proj_weight = jax.random.uniform(k1, (3 * E, E), jnp.float32,
                                        -bound_in, bound_in)
    in_proj_bias = 0.02 * jax.random.normal(k2, (3 * E,), jnp.float32)
    bound_out = (1.0 / E) ** 0.5
    out_proj_weight = jax.random.uniform(k3, (E, E), jnp.float32,
                                         -bound_out, bound_out)
    out_proj_bias = 0.02 * jax.random.normal(k4, (E,), jnp.float32)

    out = global_self_attention(x, in_proj_weight, in_proj_bias,
                                out_proj_weight, out_proj_bias, num_heads=H)
    out = jax.block_until_ready(out)

    ref = _reference(x, in_proj_weight, in_proj_bias,
                     out_proj_weight, out_proj_bias, H)
    assert out.shape == (B, S, E)
    # Tolerance accounts for bf16 MXU operands + approx (EUP) reciprocal in the
    # kernel vs. a pure-f32 reference.
    err = float(jnp.max(jnp.abs(out - ref)))
    assert jnp.allclose(out, ref, atol=2e-2, rtol=2e-2), \
        f"mismatch vs reference, max abs err={err}"

    print("KERNEL_OK")
</pallas_src>

<mosaic_0001>
module attributes {stable_mosaic.version = 11 : i64} {
  func.func @_mha_kernel(%arg0: i32, %arg1: memref<16x32xf32, #tpu.memory_space<vmem>>, %arg2: memref<32x96xbf16, #tpu.memory_space<vmem>>, %arg3: memref<1x96xf32, #tpu.memory_space<vmem>>, %arg4: memref<32x128xbf16, #tpu.memory_space<vmem>>, %arg5: memref<1x128xf32, #tpu.memory_space<vmem>>, %arg6: memref<16x128xf32, #tpu.memory_space<vmem>>) attributes {dimension_semantics = [#tpu.dimension_semantics<parallel>], iteration_bounds = array<i64: 1>, scalar_prefetch = 0 : i64, scratch_operands = 0 : i64, tpu.core_type = #tpu.core_type<tc>, window_params = [{transform_indices = @transform_0, window_bounds = array<i64: 16, 32>}, {pipeline_mode = #tpu.pipeline_mode<synchronous>, transform_indices = @transform_1, window_bounds = array<i64: 32, 96>}, {pipeline_mode = #tpu.pipeline_mode<synchronous>, transform_indices = @transform_2, window_bounds = array<i64: 1, 96>}, {pipeline_mode = #tpu.pipeline_mode<synchronous>, transform_indices = @transform_3, window_bounds = array<i64: 32, 128>}, {pipeline_mode = #tpu.pipeline_mode<synchronous>, transform_indices = @transform_4, window_bounds = array<i64: 1, 128>}, {transform_indices = @transform_5, window_bounds = array<i64: 16, 128>}]} {
    %c0 = arith.constant 0 : index
    %c0_0 = arith.constant 0 : index
    %0 = vector.load %arg1[%c0, %c0_0] : memref<16x32xf32, #tpu.memory_space<vmem>>, vector<16x32xf32>
    %1 = arith.truncf %0 : vector<16x32xf32> to vector<16x32xbf16>
    %c0_1 = arith.constant 0 : index
    %c0_2 = arith.constant 0 : index
    %2 = vector.load %arg2[%c0_1, %c0_2] : memref<32x96xbf16, #tpu.memory_space<vmem>>, vector<32x96xbf16>
    %cst = arith.constant dense<0.000000e+00> : vector<16x96xf32>
    %3 = tpu.matmul %1, %2, %cst {dimension_numbers = #tpu.dot_dimension_numbers<[1], [0], [0], [1], [0, 0, 1, 1], [], []>} : vector<16x32xbf16>, vector<32x96xbf16>, vector<16x96xf32> -> vector<16x96xf32>
    %c0_3 = arith.constant 0 : index
    %c0_4 = arith.constant 0 : index
    %4 = vector.load %arg3[%c0_3, %c0_4] : memref<1x96xf32, #tpu.memory_space<vmem>>, vector<1x96xf32>
    %5 = vector.broadcast %4 : vector<1x96xf32> to vector<16x96xf32>
    %6 = arith.addf %3, %5 : vector<16x96xf32>
    %7 = vector.extract_strided_slice %6 {offsets = [0, 0], sizes = [16, 8], strides = [1, 1]} : vector<16x96xf32> to vector<16x8xf32>
    %8 = vector.extract_strided_slice %6 {offsets = [0, 8], sizes = [16, 8], strides = [1, 1]} : vector<16x96xf32> to vector<16x8xf32>
    %9 = vector.extract_strided_slice %6 {offsets = [0, 16], sizes = [16, 8], strides = [1, 1]} : vector<16x96xf32> to vector<16x8xf32>
    %10 = vector.extract_strided_slice %6 {offsets = [0, 24], sizes = [16, 8], strides = [1, 1]} : vector<16x96xf32> to vector<16x8xf32>
    %11 = vector.shape_cast %7 : vector<16x8xf32> to vector<1x16x8xf32>
    %12 = vector.shape_cast %8 : vector<16x8xf32> to vector<1x16x8xf32>
    %13 = vector.shape_cast %9 : vector<16x8xf32> to vector<1x16x8xf32>
    %14 = vector.shape_cast %10 : vector<16x8xf32> to vector<1x16x8xf32>
    %15 = tpu.concatenate %11, %12, %13, %14 in 0 : vector<1x16x8xf32>, vector<1x16x8xf32>, vector<1x16x8xf32>, vector<1x16x8xf32> -> vector<4x16x8xf32>
    %16 = vector.shape_cast %15 : vector<4x16x8xf32> to vector<4x2x8x8xf32>
    %17 = vector.shape_cast %16 : vector<4x2x8x8xf32> to vector<8x8x8xf32>
    %18 = arith.truncf %17 : vector<8x8x8xf32> to vector<8x8x8xbf16>
    %19 = vector.extract_strided_slice %6 {offsets = [0, 32], sizes = [16, 8], strides = [1, 1]} : vector<16x96xf32> to vector<16x8xf32>
    %20 = vector.extract_strided_slice %6 {offsets = [0, 40], sizes = [16, 8], strides = [1, 1]} : vector<16x96xf32> to vector<16x8xf32>
    %21 = vector.extract_strided_slice %6 {offsets = [0, 48], sizes = [16, 8], strides = [1, 1]} : vector<16x96xf32> to vector<16x8xf32>
    %22 = vector.extract_strided_slice %6 {offsets = [0, 56], sizes = [16, 8], strides = [1, 1]} : vector<16x96xf32> to vector<16x8xf32>
    %23 = vector.shape_cast %19 : vector<16x8xf32> to vector<1x16x8xf32>
    %24 = vector.shape_cast %20 : vector<16x8xf32> to vector<1x16x8xf32>
    %25 = vector.shape_cast %21 : vector<16x8xf32> to vector<1x16x8xf32>
    %26 = vector.shape_cast %22 : vector<16x8xf32> to vector<1x16x8xf32>
    %27 = tpu.concatenate %23, %24, %25, %26 in 0 : vector<1x16x8xf32>, vector<1x16x8xf32>, vector<1x16x8xf32>, vector<1x16x8xf32> -> vector<4x16x8xf32>
    %28 = vector.shape_cast %27 : vector<4x16x8xf32> to vector<4x2x8x8xf32>
    %29 = vector.shape_cast %28 : vector<4x2x8x8xf32> to vector<8x8x8xf32>
    %30 = arith.truncf %29 : vector<8x8x8xf32> to vector<8x8x8xbf16>
    %31 = vector.extract_strided_slice %6 {offsets = [0, 64], sizes = [16, 8], strides = [1, 1]} : vector<16x96xf32> to vector<16x8xf32>
    %32 = vector.extract_strided_slice %6 {offsets = [0, 72], sizes = [16, 8], strides = [1, 1]} : vector<16x96xf32> to vector<16x8xf32>
    %33 = vector.extract_strided_slice %6 {offsets = [0, 80], sizes = [16, 8], strides = [1, 1]} : vector<16x96xf32> to vector<16x8xf32>
    %34 = vector.extract_strided_slice %6 {offsets = [0, 88], sizes = [16, 8], strides = [1, 1]} : vector<16x96xf32> to vector<16x8xf32>
    %35 = vector.shape_cast %31 : vector<16x8xf32> to vector<1x16x8xf32>
    %36 = vector.shape_cast %32 : vector<16x8xf32> to vector<1x16x8xf32>
    %37 = vector.shape_cast %33 : vector<16x8xf32> to vector<1x16x8xf32>
    %38 = vector.shape_cast %34 : vector<16x8xf32> to vector<1x16x8xf32>
    %39 = tpu.concatenate %35, %36, %37, %38 in 0 : vector<1x16x8xf32>, vector<1x16x8xf32>, vector<1x16x8xf32>, vector<1x16x8xf32> -> vector<4x16x8xf32>
    %40 = vector.shape_cast %39 : vector<4x16x8xf32> to vector<4x2x8x8xf32>
    %41 = vector.shape_cast %40 : vector<4x2x8x8xf32> to vector<8x8x8xf32>
    %42 = arith.truncf %41 : vector<8x8x8xf32> to vector<8x8x8xbf16>
    "tpu.trace_start"() <{level = 10 : i32, message = "bqd,bkd->bqk"}> : () -> ()
    %cst_5 = arith.constant dense<0.000000e+00> : vector<8x8x8xf32>
    %43 = tpu.matmul %18, %30, %cst_5 {dimension_numbers = #tpu.dot_dimension_numbers<[2], [2], [1], [1], [0, 0, 0, 1, 1, 1], [0], [0]>} : vector<8x8x8xbf16>, vector<8x8x8xbf16>, vector<8x8x8xf32> -> vector<8x8x8xf32>
    "tpu.trace_stop"() : () -> ()
    %cst_6 = arith.constant dense<0xFF800000> : vector<8x8xf32>
    %44 = vector.multi_reduction <maximumf>, %43, %cst_6 [2] : vector<8x8x8xf32> to vector<8x8xf32>
    %45 = vector.shape_cast %44 : vector<8x8xf32> to vector<8x8x1xf32>
    %46 = vector.broadcast %45 : vector<8x8x1xf32> to vector<8x8x8xf32>
    %47 = arith.subf %43, %46 : vector<8x8x8xf32>
    %48 = math.exp %47 : vector<8x8x8xf32>
    %cst_7 = arith.constant dense<0.000000e+00> : vector<8x8xf32>
    %49 = vector.multi_reduction <add>, %48, %cst_7 [2] : vector<8x8x8xf32> to vector<8x8xf32>
    %50 = vector.shape_cast %49 : vector<8x8xf32> to vector<8x8x1xf32>
    %51 = tpu.reciprocal %50 {approx = true} : vector<8x8x1xf32> -> vector<8x8x1xf32>
    %52 = vector.broadcast %51 : vector<8x8x1xf32> to vector<8x8x8xf32>
    %53 = arith.mulf %48, %52 : vector<8x8x8xf32>
    %54 = arith.truncf %53 : vector<8x8x8xf32> to vector<8x8x8xbf16>
    "tpu.trace_start"() <{level = 10 : i32, message = "bqk,bkd->bqd"}> : () -> ()
    %cst_8 = arith.constant dense<0.000000e+00> : vector<8x8x8xf32>
    %55 = tpu.matmul %54, %42, %cst_8 {dimension_numbers = #tpu.dot_dimension_numbers<[2], [1], [1], [2], [0, 0, 0, 1, 1, 2], [0], [0]>} : vector<8x8x8xbf16>, vector<8x8x8xbf16>, vector<8x8x8xf32> -> vector<8x8x8xf32>
    "tpu.trace_stop"() : () -> ()
    %56 = vector.shape_cast %55 : vector<8x8x8xf32> to vector<4x2x8x8xf32>
    %57 = vector.shape_cast %56 : vector<4x2x8x8xf32> to vector<4x16x8xf32>
    %58 = vector.extract_strided_slice %57 {offsets = [0, 0, 0], sizes = [1, 16, 8], strides = [1, 1, 1]} : vector<4x16x8xf32> to vector<1x16x8xf32>
    %59 = vector.shape_cast %58 : vector<1x16x8xf32> to vector<16x8xf32>
    %60 = vector.extract_strided_slice %57 {offsets = [1, 0, 0], sizes = [1, 16, 8], strides = [1, 1, 1]} : vector<4x16x8xf32> to vector<1x16x8xf32>
    %61 = vector.shape_cast %60 : vector<1x16x8xf32> to vector<16x8xf32>
    %62 = vector.extract_strided_slice %57 {offsets = [2, 0, 0], sizes = [1, 16, 8], strides = [1, 1, 1]} : vector<4x16x8xf32> to vector<1x16x8xf32>
    %63 = vector.shape_cast %62 : vector<1x16x8xf32> to vector<16x8xf32>
    %64 = vector.extract_strided_slice %57 {offsets = [3, 0, 0], sizes = [1, 16, 8], strides = [1, 1, 1]} : vector<4x16x8xf32> to vector<1x16x8xf32>
    %65 = vector.shape_cast %64 : vector<1x16x8xf32> to vector<16x8xf32>
    %66 = tpu.concatenate %59, %61, %63, %65 in 1 : vector<16x8xf32>, vector<16x8xf32>, vector<16x8xf32>, vector<16x8xf32> -> vector<16x32xf32>
    %67 = arith.truncf %66 : vector<16x32xf32> to vector<16x32xbf16>
    %c0_9 = arith.constant 0 : index
    %c0_10 = arith.constant 0 : index
    %68 = vector.load %arg4[%c0_9, %c0_10] : memref<32x128xbf16, #tpu.memory_space<vmem>>, vector<32x128xbf16>
    %cst_11 = arith.constant dense<0.000000e+00> : vector<16x128xf32>
    %69 = tpu.matmul %67, %68, %cst_11 {dimension_numbers = #tpu.dot_dimension_numbers<[1], [0], [0], [1], [0, 0, 1, 1], [], []>} : vector<16x32xbf16>, vector<32x128xbf16>, vector<16x128xf32> -> vector<16x128xf32>
    %c0_12 = arith.constant 0 : index
    %c0_13 = arith.constant 0 : index
    %70 = vector.load %arg5[%c0_12, %c0_13] : memref<1x128xf32, #tpu.memory_space<vmem>>, vector<1x128xf32>
    %71 = vector.broadcast %70 : vector<1x128xf32> to vector<16x128xf32>
    %72 = arith.addf %69, %71 : vector<16x128xf32>
    %c0_14 = arith.constant 0 : index
    %c0_15 = arith.constant 0 : index
    %73 = vector.load %arg6[%c0_14, %c0_15] : memref<16x128xf32, #tpu.memory_space<vmem>>, vector<16x128xf32>
    tpu.vector_store %arg6[%c0_14, %c0_15], %72 {strides = array<i32>} : memref<16x128xf32, #tpu.memory_space<vmem>>, vector<16x128xf32>,
    return
  }
  func.func @transform_0(%arg0: i32) -> (i32, i32) {
    %c0_i32 = arith.constant 0 : i32
    %c0_i32_0 = arith.constant 0 : i32
    return %arg0, %c0_i32 : i32, i32
  }
  func.func @transform_1(%arg0: i32) -> (i32, i32) {
    %c0_i32 = arith.constant 0 : i32
    %c0_i32_0 = arith.constant 0 : i32
    %c0_i32_1 = arith.constant 0 : i32
    return %c0_i32, %c0_i32_0 : i32, i32
  }
  func.func @transform_2(%arg0: i32) -> (i32, i32) {
    %c0_i32 = arith.constant 0 : i32
    %c0_i32_0 = arith.constant 0 : i32
    %c0_i32_1 = arith.constant 0 : i32
    return %c0_i32, %c0_i32_0 : i32, i32
  }
  func.func @transform_3(%arg0: i32) -> (i32, i32) {
    %c0_i32 = arith.constant 0 : i32
    %c0_i32_0 = arith.constant 0 : i32
    %c0_i32_1 = arith.constant 0 : i32
    return %c0_i32, %c0_i32_0 : i32, i32
  }
  func.func @transform_4(%arg0: i32) -> (i32, i32) {
    %c0_i32 = arith.constant 0 : i32
    %c0_i32_0 = arith.constant 0 : i32
    %c0_i32_1 = arith.constant 0 : i32
    return %c0_i32, %c0_i32_0 : i32, i32
  }
  func.func @transform_5(%arg0: i32) -> (i32, i32) {
    %c0_i32 = arith.constant 0 : i32
    %c0_i32_0 = arith.constant 0 : i32
    return %arg0, %c0_i32 : i32, i32
  }
}

</mosaic_0001>

<bundles_post_ra>
// kernel: tpu_custom_call.1
= control target key start
LH: loop header
LB: loop body
LE: loop exit
PB: predicated region body
PF: predicated region fallthrough
CT: control target
= control target key end

     0   :  { %10 = vsyncpa [#allocation3], 0  ;;  %s1805_s0 = inlined_call_operand.hbm [shape: f32[16,32], index: 0, kind: input, shape index: {}]   ;;  %s1806_s1 = inlined_call_operand.hbm [shape: bf16[32,96], index: 1, kind: input, shape index: {}]   ;;  %s1807_s2 = inlined_call_operand.vmem [shape: f32[1,96], index: 2, kind: input, shape index: {}]   ;;  %s1808_s3 = inlined_call_operand.hbm [shape: bf16[32,128], index: 3, kind: input, shape index: {}]   ;;  %s1809_s4 = inlined_call_operand.vmem [shape: f32[1,128], index: 4, kind: input, shape index: {}]   ;;  %s1810_s5 = inlined_call_operand.hbm [shape: f32[16,128], index: 5, kind: output, shape index: {}]  }
   0x1   :  { %11 = vsyncpa [#allocation6], 0 }
   0x2   :  { %12 = vsyncpa [#allocation4], 0  ;;  %s1506_s18 = smov [#allocation5]   ;;  %s1412_s22 = scalar_lea.hbm %s1806_s1, 256 }
   0x3   :  { %s30_s19 = sshll.u32 %s1506_s18, 4  ;;  %p1413_p0 = scmp.ne.s32.totalorder %s1806_s1, %s1412_s22  ;;  %s31_s19 = int_to_ptr.vmem [resolvable:$true] %s30_s19 }
   0x4   :  { %p1416_p1 = scmp.lt.u32.totalorder %s1412_s22, %s1806_s1 }
   0x6   :  { %p1418_p2 = pnand %p1416_p1, %p1413_p0 }
   0x8   :  { %1421 = shalt.err (!%p1418_p2)
}
   0x9   :  { %s1422_s27 = scalar_lea.vmem %s31_s19, 256  ;;  %p1427_p4 = scmp.lt.s32.totalorder %s31_s19, %s31_s19 }
   0xa   :  { %p1423_p3 = scmp.ne.s32.totalorder %s31_s19, %s1422_s27  ;;  %p1428_p5 = scmp.lt.s32.totalorder %s1422_s27, %s1422_s27 }
   0xc   :  { %p1429_p6 = por %p1428_p5, %p1427_p4 }
   0xe   :  { %p1430_p7 = pnand %p1429_p6, %p1423_p3 }
  0x10   :  { %1433 = shalt.err (!%p1430_p7)
}
  0x11   :  { %s1507_s28 = smov 64   ;;  %s1508_s29 = smov 4  }
  0x12   :  { %36 = dma.hbm_to_vmem [thread:$0]  %s1806_s1, 256, %s31_s19, [#allocation6], %s1507_s28, %s1507_s28, %s1508_s29  }
  0x13   :  { %s1509_s7 = smov [#allocation2]   ;;  %s1434_s11 = scalar_lea.hbm %s1805_s0, 256 }
  0x14   :  { %s18_s8 = sshll.u32 %s1509_s7, 4  ;;  %p1435_p8 = scmp.ne.s32.totalorder %s1805_s0, %s1434_s11  ;;  %s19_s8 = int_to_ptr.vmem [resolvable:$true] %s18_s8 }
  0x15   :  { %p1438_p9 = scmp.lt.u32.totalorder %s1434_s11, %s1805_s0 }
  0x17   :  { %p1440_p10 = pnand %p1438_p9, %p1435_p8 }
  0x19   :  { %1443 = shalt.err (!%p1440_p10)
}
  0x1a   :  { %s1444_s16 = scalar_lea.vmem %s19_s8, 256  ;;  %p1449_p12 = scmp.lt.s32.totalorder %s19_s8, %s19_s8 }
  0x1b   :  { %p1445_p11 = scmp.ne.s32.totalorder %s19_s8, %s1444_s16  ;;  %p1450_p13 = scmp.lt.s32.totalorder %s1444_s16, %s1444_s16 }
  0x1d   :  { %p1451_p0 = por %p1450_p13, %p1449_p12 }
  0x1f   :  { %p1452_p1 = pnand %p1451_p0, %p1445_p11 }
  0x21   :  { %1455 = shalt.err (!%p1452_p1)
}
  0x22   :  { %s1510_s1 = smov 128   ;;  %s1511_s17 = smov 8  }
  0x23   :  { %24 = dma.hbm_to_vmem [thread:$0]  %s1805_s0, 256, %s19_s8, [#allocation3], %s1510_s1, %s1510_s1, %s1511_s17  }
  0x24   :  { %s1512_s20 = smov [#allocation7]   ;;  %s1456_s24 = scalar_lea.hbm %s1808_s3, 256 }
  0x25   :  { %s44_s21 = sshll.u32 %s1512_s20, 4  ;;  %p1457_p2 = scmp.ne.s32.totalorder %s1808_s3, %s1456_s24  ;;  %s45_s21 = int_to_ptr.vmem [resolvable:$true] %s44_s21 }
  0x26   :  { %p1460_p3 = scmp.lt.u32.totalorder %s1456_s24, %s1808_s3 }
  0x28   :  { %p1462_p4 = pnand %p1460_p3, %p1457_p2 }
  0x2a   :  { %1465 = shalt.err (!%p1462_p4)
}
  0x2b   :  { %s1466_s6 = scalar_lea.vmem %s45_s21, 256  ;;  %p1471_p6 = scmp.lt.s32.totalorder %s45_s21, %s45_s21 }
  0x2c   :  { %p1467_p5 = scmp.ne.s32.totalorder %s45_s21, %s1466_s6  ;;  %p1472_p7 = scmp.lt.s32.totalorder %s1466_s6, %s1466_s6 }
  0x2e   :  { %p1473_p8 = por %p1472_p7, %p1471_p6 }
  0x30   :  { %p1474_p9 = pnand %p1473_p8, %p1467_p5 }
  0x32   :  { %1477 = shalt.err (!%p1474_p9)
}
  0x33   :  { %50 = dma.hbm_to_vmem [thread:$0]  %s1808_s3, 256, %s45_s21, [#allocation6], %s1507_s28, %s1507_s28, %s1508_s29  }
  0x34   :  { %1500 = dma.done.wait [#allocation3], 256  }
  0x35   :  { %1501 = vsyncadd [#allocation3], 4294967040 }
  0x36   :  { %1502 = dma.done.wait [#allocation6], 512  }
  0x37   :  { %1503 = vsyncadd [#allocation6], 4294966784  ;;  %v1513_v0 = vmov 0.0   ;;  %vm1514_vm0 = vmmov 0   ;;  %v1376_v1 = vld [vmem:[#allocation5] sm:$0xff]   ;;  %v1377_v2 = vld [vmem:[#allocation5 + $0x8] sm:$0xff]  }
  0x38   :  { %1218 = vmatprep.subr.bf16.mxu0 %v1513_v0  ;;  %1222 = vmatprep.mubr.msk.bf16.mxu0 %vm1514_vm0, %v1513_v0  ;;  %v63_v3 = vld [vmem:[#allocation2] sm:$0xff]  ;;  %v64_v4 = vld [vmem:[#allocation2 + $0x8] sm:$0xff]  ;;  %vm89_vm1 = vcmask 261120   ;;  %s1515_s8 = smov 104   ;;  %s1516_s9 = smov 120   ;;  %vm165_vm2 = vcmask 64512  }
  0x39   :  { %1226 = vmatprep.subr.bf16.mxu1 %v1513_v0  ;;  %1228 = vmatprep.mubr.msk.bf16.mxu1 %vm1514_vm0, %v1513_v0  ;;  %v65_v5 = vpack.c.bf16 %v64_v4, %v63_v3  ;;  %v1156_v6 = vld [vmem:[%s1807_s2] ss:$0 sm:$0xff]  ;;  %s1517_s10 = smov 96   ;;  %s1518_s11 = smov 112   ;;  %vm656_vm3 = vcmask 1043456   ;;  %vm1062_vm4 = vcmask 130048  }
  0x3a   :  { %1219 = vmatpush3.bf16.msra.mxu0 %v1376_v1  ;;  %s1519_s2 = smov 16   ;;  %vm1065_vm5 = vcmask 195584   ;;  %s1521_s14 = smov [#allocation8]  }
  0x3b   :  { %1220 = vmatprep.subr.bf16.mxu0 %v1513_v0  ;;  %s1143_s15 = sshll.u32 %s1521_s14, 4  ;;  %s1144_s15 = int_to_ptr.vmem [resolvable:$true] %s1143_s15 }
  0x3c   :  { %s1478_s16 = scalar_lea.vmem %s1144_s15, 256  ;;  %p1483_p11 = scmp.lt.s32.totalorder %s1144_s15, %s1144_s15 }
  0x3d   :  { %p1479_p10 = scmp.ne.s32.totalorder %s1144_s15, %s1478_s16  ;;  %p1484_p12 = scmp.lt.s32.totalorder %s1478_s16, %s1478_s16 }
  0x3e   :  { %1221 = vmatpush3.bf16.msra.mxu0 %v1377_v2 }
  0x3f   :  { %1232 = vmatprep.subr.bf16.mxu0 %v1513_v0  ;;  %p1485_p13 = por %p1484_p12, %p1483_p11 }
  0x41   :  { %1223 = vmatmul.mubr.msk.bf16.vlgmr.msra.gmra.mrb[0].mxu0 %vm89_vm1, %v65_v5  ;;  %p1486_p0 = pnand %p1485_p13, %p1479_p10 }
  0x42   :  { %1234 = vmatprep.mubr.msk.bf16.mxu0 %vm1514_vm0, %v1513_v0 }
 0x114   :  { %v127_v7 = vpop.f32.mrb[0].mxu0 }
 0x115   :  { %v1224_v8 = vpop.f32.mrb[1].mxu0  ;;  %v128_v10 = vadd.f32 %v1156_v6, %v127_v7 }
 0x116   :  { %v130_v9 = vpop.f32.mrb[2].mxu0 }
 0x117   :  { %v131_v11 = vadd.f32 %v1156_v6, %v130_v9  ;;  %v1225_v12 = vpop.f32.mrb[3].mxu0  ;;  %v154_v14 = vpack.c.bf16 %v128_v10, %v128_v10 }
 0x119   :  { %v1356_v13 = vpack.i.bf16 %v131_v11, %v128_v10  ;;  %v155_v15 = vpack.c.bf16 %v131_v11, %v131_v11 }
 0x11b   :  { %1357 = vrot.lane.b32.xlu1 %v1356_v13, %s1515_s8  ;;  %1347 = vrot.lane.b32.xlu0 %v1356_v13, %s1516_s9 }
 0x11f   :  { %163 = vrot.lane.b32.xlu1 %v154_v14, %s1517_s10  ;;  %1352 = vrot.lane.b32.xlu0 %v1356_v13, %s1518_s11 }
 0x123   :  { %213 = vrot.lane.b32.xlu0 %v155_v15, %s1517_s10 }
 0x18d   :  { %v1358_v16 = vpop.permute.xlu1 %1357  ;;  %v1348_v17 = vpop.permute.xlu0 %1347 }
 0x18e   :  { %v1350_v18 = vunpack.i.h.bf16 %v1348_v17  ;;  %v1349_v19 = vunpack.i.l.bf16 %v1348_v17  ;;  %v1359_v27 = vunpack.i.l.bf16 %v1358_v16  ;;  %v1360_v30 = vunpack.i.h.bf16 %v1358_v16 }
 0x190   :  { %v1613_v20 = vpack.c.bf16 %v1350_v18, %v1350_v18  ;;  %v1615_v21 = vpack.c.bf16 %v1349_v19, %v1349_v19  ;;  %v1632_v33 = vpack.c.bf16 %v1359_v27, %v1359_v27  ;;  %v1635_v34 = vpack.c.bf16 %v1360_v30, %v1360_v30 }
 0x191   :  { %v164_v22 = vpop.permute.xlu1 %163  ;;  %v1353_v23 = vpop.permute.xlu0 %1352 }
 0x192   :  { %v1355_v24 = vunpack.i.h.bf16 %v1353_v23  ;;  %v1354_v25 = vunpack.i.l.bf16 %v1353_v23  ;;  %262 = vrot.lane.b32.xlu1 %v1615_v21, %s1517_s10  ;;  %311 = vrot.lane.b32.xlu0 %v1613_v20, %s1517_s10  ;;  %v170_v26 = vsel %vm165_vm2, %v164_v22, 0 }
 0x193   :  { %1227 = vmatpush3.bf16.xpose.msra.mxu1 %v170_v26 }
 0x194   :  { %v1622_v28 = vpack.c.bf16 %v1355_v24, %v1355_v24  ;;  %v1624_v29 = vpack.c.bf16 %v1354_v25, %v1354_v25  ;;  %1238 = vmatprep.subr.bf16.mxu1 %v1513_v0 }
 0x195   :  { %v214_v31 = vpop.permute.xlu0 %213 }
 0x196   :  { %v219_v32 = vsel %vm165_vm2, %v214_v31, 0  ;;  %360 = vrot.lane.b32.xlu1 %v1624_v29, %s1517_s10  ;;  %409 = vrot.lane.b32.xlu0 %v1622_v28, %s1517_s10 }
 0x197   :  { %1233 = vmatpush3.bf16.xpose.msra.mxu0 %v219_v32 }
 0x198   :  { %1244 = vmatprep.subr.bf16.mxu0 %v1513_v0 }
 0x19a   :  { %1229 = vmatmul.mubr.msk.bf16.vlgmr.msra.gmra.mrb[0].mxu1 %vm165_vm2, %v154_v14  ;;  %458 = vrot.lane.b32.xlu1 %v1632_v33, %s1517_s10 }
 0x19b   :  { %507 = vrot.lane.b32.xlu0 %v1635_v34, %s1517_s10  ;;  %1240 = vmatprep.mubr.msk.bf16.mxu1 %vm1514_vm0, %v1513_v0 }
 0x19e   :  { %700 = vrot.lane.b32.xlu1 %v155_v15, %s1507_s28  ;;  %1235 = vmatmul.mubr.msk.bf16.vlgmr.msra.gmra.mrb[4].mxu0 %vm165_vm2, %v155_v15 }
 0x19f   :  { %651 = vrot.lane.b32.xlu0 %v154_v14, %s1507_s28  ;;  %1246 = vmatprep.mubr.msk.bf16.mxu0 %vm1514_vm0, %v1513_v0 }
 0x204   :  { %v263_v35 = vpop.permute.xlu1 %262  ;;  %v312_v36 = vpop.permute.xlu0 %311 }
 0x205   :  { %v268_v37 = vsel %vm165_vm2, %v263_v35, 0  ;;  %v317_v38 = vsel %vm165_vm2, %v312_v36, 0 }
 0x206   :  { %1239 = vmatpush3.bf16.xpose.msra.mxu1 %v268_v37  ;;  %1245 = vmatpush3.bf16.xpose.msra.mxu0 %v317_v38 }
 0x207   :  { %1250 = vmatprep.subr.bf16.mxu1 %v1513_v0  ;;  %1256 = vmatprep.subr.bf16.mxu0 %v1513_v0 }
 0x208   :  { %v361_v39 = vpop.permute.xlu1 %360  ;;  %v410_v40 = vpop.permute.xlu0 %409 }
 0x209   :  { %v366_v41 = vsel %vm165_vm2, %v361_v39, 0  ;;  %v415_v42 = vsel %vm165_vm2, %v410_v40, 0 }
 0x20c   :  { %v459_v43 = vpop.permute.xlu1 %458 }
 0x20d   :  { %1241 = vmatmul.mubr.msk.bf16.vlgmr.msra.gmra.mrb[4].mxu1 %vm165_vm2, %v1615_v21  ;;  %1247 = vmatmul.mubr.msk.bf16.vlgmr.msra.gmra.mrb[8].mxu0 %vm165_vm2, %v1613_v20  ;;  %v508_v44 = vpop.permute.xlu0 %507  ;;  %v464_v45 = vsel %vm165_vm2, %v459_v43, 0 }
 0x20e   :  { %1251 = vmatpush3.bf16.xpose.msra.mxu1 %v366_v41  ;;  %1257 = vmatpush3.bf16.xpose.msra.mxu0 %v415_v42  ;;  %v513_v46 = vsel %vm165_vm2, %v508_v44, 0 }
 0x20f   :  { %1252 = vmatprep.mubr.msk.bf16.mxu1 %vm1514_vm0, %v1513_v0  ;;  %1258 = vmatprep.mubr.msk.bf16.mxu0 %vm1514_vm0, %v1513_v0 }
 0x210   :  { %1262 = vmatprep.subr.bf16.mxu1 %v1513_v0  ;;  %1268 = vmatprep.subr.bf16.mxu0 %v1513_v0  ;;  %v701_v47 = vpop.permute.xlu1 %700 }
 0x211   :  { %v652_v48 = vpop.permute.xlu0 %651  ;;  %v706_v49 = vsel %vm656_vm3, %v701_v47, 0 }
 0x212   :  { %v658_v50 = vsel %vm656_vm3, %v652_v48, 0 }
 0x215   :  { %1253 = vmatmul.mubr.msk.bf16.vlgmr.msra.gmra.mrb[8].mxu1 %vm165_vm2, %v1624_v29  ;;  %1259 = vmatmul.mubr.msk.bf16.vlgmr.msra.gmra.mrb[12].mxu0 %vm165_vm2, %v1622_v28 }
 0x216   :  { %1263 = vmatpush3.bf16.xpose.msra.mxu1 %v464_v45  ;;  %1269 = vmatpush3.bf16.xpose.msra.mxu0 %v513_v46 }
 0x217   :  { %1264 = vmatprep.mubr.msk.bf16.mxu1 %vm1514_vm0, %v1513_v0  ;;  %1270 = vmatprep.mubr.msk.bf16.mxu0 %vm1514_vm0, %v1513_v0 }
 0x218   :  { %1274 = vmatprep.subr.bf16.mxu1 %v1513_v0  ;;  %1280 = vmatprep.subr.bf16.mxu0 %v1513_v0 }
 0x21d   :  { %1265 = vmatmul.mubr.msk.bf16.vlgmr.msra.gmra.mrb[12].mxu1 %vm165_vm2, %v1632_v33  ;;  %1271 = vmatmul.mubr.msk.bf16.vlgmr.msra.gmra.mrb[16].mxu0 %vm165_vm2, %v1635_v34 }
 0x21e   :  { %1275 = vmatpush3.bf16.msra.mxu1 %v658_v50  ;;  %1281 = vmatpush3.bf16.msra.mxu0 %v706_v49 }
 0x21f   :  { %1276 = vmatprep.mubr.msk.bf16.mxu1 %vm1514_vm0, %v1513_v0  ;;  %1282 = vmatprep.mubr.msk.bf16.mxu0 %vm1514_vm0, %v1513_v0 }
 0x220   :  { %1286 = vmatprep.subr.bf16.mxu1 %v1513_v0  ;;  %1292 = vmatprep.subr.bf16.mxu0 %v1513_v0 }
 0x26d   :  { %v206_v51 = vpop.f32.mrb[0].mxu1 }
 0x26e   :  { %v1230_v52 = vpop.f32.mrb[1].mxu1  ;;  %v555_v53 = vsel %vm165_vm2, %v206_v51, -inf }
 0x26f   :  { %v209_v54 = vpop.f32.mrb[2].mxu1  ;;  %556 = vmax.xlane.f32.xlu1 %v555_v53 }
 0x270   :  { %v1231_v55 = vpop.f32.mrb[3].mxu1 }
 0x271   :  { %v255_v56 = vpop.f32.mrb[4].mxu0 }
 0x272   :  { %v1236_v57 = vpop.f32.mrb[5].mxu0  ;;  %v558_v58 = vsel %vm165_vm2, %v255_v56, -inf }
 0x273   :  { %559 = vmax.xlane.f32.xlu0 %v558_v58  ;;  %v258_v59 = vpop.f32.mrb[6].mxu0 }
 0x274   :  { %v1237_v60 = vpop.f32.mrb[7].mxu0 }
 0x2e0   :  { %v304_v61 = vpop.f32.mrb[4].mxu1  ;;  %v353_v62 = vpop.f32.mrb[8].mxu0 }
 0x2e1   :  { %v1242_v63 = vpop.f32.mrb[5].mxu1  ;;  %v1248_v1 = vpop.f32.mrb[9].mxu0  ;;  %v561_v2 = vsel %vm165_vm2, %v304_v61, -inf  ;;  %v564_v3 = vsel %vm165_vm2, %v353_v62, -inf }
 0x2e2   :  { %v307_v4 = vpop.f32.mrb[6].mxu1  ;;  %562 = vmax.xlane.f32.xlu0 %v561_v2  ;;  %565 = vmax.xlane.f32.xlu1 %v564_v3  ;;  %v356_v5 = vpop.f32.mrb[10].mxu0 }
 0x2e3   :  { %v1243_v6 = vpop.f32.mrb[7].mxu1  ;;  %v1249_v7 = vpop.f32.mrb[11].mxu0 }
 0x2e8   :  { %v1693_v8 = vpop.f32.mrb[8].mxu1  ;;  %v451_v9 = vpop.f32.mrb[12].mxu0 }
 0x2e9   :  { %v1254_v10 = vpop.f32.mrb[9].mxu1  ;;  %v1260_v11 = vpop.f32.mrb[13].mxu0  ;;  %v567_v12 = vsel %vm165_vm2, %v1693_v8, -inf  ;;  %v570_v13 = vsel %vm165_vm2, %v451_v9, -inf }
 0x2ea   :  { %v405_v14 = vpop.f32.mrb[10].mxu1  ;;  %568 = vmax.xlane.f32.xlu0 %v567_v12  ;;  %571 = vmax.xlane.f32.xlu1 %v570_v13  ;;  %v454_v15 = vpop.f32.mrb[14].mxu0 }
 0x2eb   :  { %v1255_v16 = vpop.f32.mrb[11].mxu1  ;;  %v1261_v17 = vpop.f32.mrb[15].mxu0 }
 0x2f0   :  { %v1698_v18 = vpop.f32.mrb[12].mxu1  ;;  %v549_v19 = vpop.f32.mrb[16].mxu0 }
 0x2f1   :  { %v1266_v22 = vpop.f32.mrb[13].mxu1  ;;  %v1272_v23 = vpop.f32.mrb[17].mxu0  ;;  %v573_v24 = vsel %vm165_vm2, %v1698_v18, -inf  ;;  %v576_v25 = vsel %vm165_vm2, %v549_v19, -inf }
 0x2f2   :  { %v503_v26 = vpop.f32.mrb[14].mxu1  ;;  %574 = vmax.xlane.f32.xlu0 %v573_v24  ;;  %577 = vmax.xlane.f32.xlu1 %v576_v25  ;;  %v552_v27 = vpop.f32.mrb[18].mxu0 }
 0x2f3   :  { %v1267_v30 = vpop.f32.mrb[15].mxu1  ;;  %v1273_v31 = vpop.f32.mrb[19].mxu0 }
 0x2fc   :  { %v557_v32 = vpop.xlane.xlu1 %556 }
 0x2fd   :  { %v579_v36 = vsub.f32 %v206_v51, %v557_v32 }
 0x2ff   :  { %v587_v38 = vmul.f32 1.442695, %v579_v36 }
 0x300   :  { %v560_v35 = vpop.xlane.xlu0 %559 }
 0x301   :  { %v580_v37 = vsub.f32 %v255_v56, %v560_v35  ;;  %1380 = vpow2.f32 %v587_v38 }
 0x303   :  { %748 = vrot.lane.b32.xlu1 %v1615_v21, %s1507_s28  ;;  %v589_v39 = vmul.f32 1.442695, %v580_v37 }
 0x305   :  { %1382 = vpow2.f32 %v589_v39 }
 0x308   :  { %796 = vrot.lane.b32.xlu0 %v1613_v20, %s1507_s28 }
 0x30b   :  { %v1381_v40 = vpop.eup %1380 }
 0x30c   :  { %v603_v42 = vsel %vm165_vm2, %v1381_v40, 0.0 }
 0x30f   :  { %v1383_v41 = vpop.eup %1382 }
 0x310   :  { %v606_v43 = vsel %vm165_vm2, %v1383_v41, 0.0 }
 0x327   :  { %604 = vadd.xlane.f32.xlu0 %v603_v42  ;;  %607 = vadd.xlane.f32.xlu1 %v606_v43 }
 0x338   :  { %844 = vrot.lane.b32.xlu1 %v1624_v29, %s1507_s28 }
 0x36f   :  { %v563_v20 = vpop.xlane.xlu0 %562  ;;  %v566_v21 = vpop.xlane.xlu1 %565 }
 0x370   :  { %v581_v44 = vsub.f32 %v304_v61, %v563_v20  ;;  %v582_v45 = vsub.f32 %v353_v62, %v566_v21 }
 0x372   :  { %v591_v46 = vmul.f32 1.442695, %v581_v44  ;;  %v593_v47 = vmul.f32 1.442695, %v582_v45 }
 0x374   :  { %1384 = vpow2.f32 %v591_v46 }
 0x375   :  { %1386 = vpow2.f32 %v593_v47 }
 0x377   :  { %v572_v48 = vpop.xlane.xlu1 %571  ;;  %v569_v61 = vpop.xlane.xlu0 %568 }
 0x378   :  { %v584_v49 = vsub.f32 %v451_v9, %v572_v48  ;;  %v583_v62 = vsub.f32 %v1693_v8, %v569_v61 }
 0x37a   :  { %v597_v50 = vmul.f32 1.442695, %v584_v49  ;;  %v595_v1 = vmul.f32 1.442695, %v583_v62 }
 0x37c   :  { %1388 = vpow2.f32 %v597_v50 }
 0x37e   :  { %v1711_v51 = vpop.eup %1384 }
 0x37f   :  { %v1713_v52 = vpop.eup %1386  ;;  %v578_v53 = vpop.xlane.xlu1 %577  ;;  %v609_v29 = vsel %vm165_vm2, %v1711_v51, 0.0 }
 0x380   :  { %v586_v54 = vsub.f32 %v549_v19, %v578_v53  ;;  %610 = vadd.xlane.f32.xlu0 %v609_v29  ;;  %v612_v55 = vsel %vm165_vm2, %v1713_v52, 0.0  ;;  %v575_v63 = vpop.xlane.xlu0 %574 }
 0x381   :  { %613 = vadd.xlane.f32.xlu1 %v612_v55  ;;  %v585_v2 = vsub.f32 %v1698_v18, %v575_v63 }
 0x382   :  { %v601_v56 = vmul.f32 1.442695, %v586_v54 }
 0x383   :  { %v599_v3 = vmul.f32 1.442695, %v585_v2  ;;  %v749_v5 = vpop.permute.xlu1 %748 }
 0x384   :  { %1390 = vpow2.f32 %v601_v56  ;;  %v797_v4 = vpop.permute.xlu0 %796  ;;  %v754_v16 = vsel %vm656_vm3, %v749_v5, 0 }
 0x385   :  { %1392 = vpow2.f32 %v595_v1  ;;  %v802_v17 = vsel %vm656_vm3, %v797_v4, 0 }
 0x386   :  { %v1719_v57 = vpop.eup %1388  ;;  %1394 = vpow2.f32 %v599_v3 }
 0x387   :  { %v618_v58 = vsel %vm165_vm2, %v1719_v57, 0.0 }
 0x388   :  { %619 = vadd.xlane.f32.xlu1 %v618_v58 }
 0x38e   :  { %v1723_v59 = vpop.eup %1390 }
 0x38f   :  { %v624_v60 = vsel %vm165_vm2, %v1723_v59, 0.0  ;;  %v1733_v6 = vpop.eup %1392 }
 0x390   :  { %625 = vadd.xlane.f32.xlu1 %v624_v60  ;;  %v1737_v8 = vpop.eup %1394 }
 0x396   :  { %892 = vrot.lane.b32.xlu0 %v1622_v28, %s1507_s28  ;;  %v615_v28 = vsel %vm165_vm2, %v1733_v6, 0.0 }
 0x3a1   :  { %940 = vrot.lane.b32.xlu1 %v1632_v33, %s1507_s28  ;;  %v621_v33 = vsel %vm165_vm2, %v1737_v8, 0.0 }
 0x3b4   :  { %v605_v7 = vpop.xlane.xlu0 %604  ;;  %v608_v9 = vpop.xlane.xlu1 %607 }
 0x3b5   :  { %1396 = vrcp.f32 %v605_v7  ;;  %616 = vadd.xlane.f32.xlu0 %v615_v28 }
 0x3b6   :  { %1398 = vrcp.f32 %v608_v9 }
 0x3b8   :  { %v845_v18 = vpop.permute.xlu1 %844 }
 0x3b9   :  { %622 = vadd.xlane.f32.xlu0 %v621_v33  ;;  %v850_v35 = vsel %vm656_vm3, %v845_v18, 0 }
 0x3bf   :  { %v1397_v10 = vpop.eup %1396 }
 0x3c0   :  { %v1399_v11 = vpop.eup %1398  ;;  %v635_v12 = vmul.f32 %v1397_v10, %v1381_v40 }
 0x3c1   :  { %v636_v13 = vmul.f32 %v1399_v11, %v1383_v41 }
 0x3c2   :  { %v643_v14 = vpack.c.bf16 %v635_v12, %v635_v12 }
 0x3c3   :  { %v644_v15 = vpack.c.bf16 %v636_v13, %v636_v13 }
 0x3c4   :  { %1277 = vmatmul.mubr.msk.bf16.vlgmr.msra.gmra.mrb[16].mxu1 %vm165_vm2, %v643_v14  ;;  %v1379_v14 = vld [vmem:[#allocation7 + $0x8] sm:$0xff]  }
 0x3c5   :  { %1283 = vmatmul.mubr.msk.bf16.vlgmr.msra.gmra.mrb[20].mxu0 %vm165_vm2, %v644_v15  ;;  %1287 = vmatpush3.bf16.msra.mxu1 %v754_v16 }
 0x3c6   :  { %1293 = vmatpush3.bf16.msra.mxu0 %v802_v17  ;;  %1288 = vmatprep.mubr.msk.bf16.mxu1 %vm1514_vm0, %v1513_v0 }
 0x3c7   :  { %1294 = vmatprep.mubr.msk.bf16.mxu0 %vm1514_vm0, %v1513_v0  ;;  %1298 = vmatprep.subr.bf16.mxu1 %v1513_v0 }
 0x3c8   :  { %1304 = vmatprep.subr.bf16.mxu0 %v1513_v0 }
 0x3cf   :  { %988 = vrot.lane.b32.xlu0 %v1635_v34, %s1507_s28  ;;  %s1520_s28 = smov 24  }
 0x40d   :  { %v611_v19 = vpop.xlane.xlu0 %610 }
 0x40e   :  { %1400 = vrcp.f32 %v611_v19  ;;  %v614_v22 = vpop.xlane.xlu1 %613 }
 0x40f   :  { %1402 = vrcp.f32 %v614_v22 }
 0x411   :  { %v893_v30 = vpop.permute.xlu0 %892 }
 0x412   :  { %v898_v34 = vsel %vm656_vm3, %v893_v30, 0 }
 0x415   :  { %v620_v23 = vpop.xlane.xlu1 %619 }
 0x416   :  { %1404 = vrcp.f32 %v620_v23 }
 0x418   :  { %v1401_v24 = vpop.eup %1400 }
 0x419   :  { %v1403_v25 = vpop.eup %1402  ;;  %v637_v26 = vmul.f32 %v1401_v24, %v1711_v51 }
 0x41a   :  { %v638_v27 = vmul.f32 %v1403_v25, %v1713_v52 }
 0x41b   :  { %v645_v31 = vpack.c.bf16 %v637_v26, %v637_v26 }
 0x41c   :  { %v646_v32 = vpack.c.bf16 %v638_v27, %v638_v27 }
 0x41d   :  { %1289 = vmatmul.mubr.msk.bf16.vlgmr.msra.gmra.mrb[20].mxu1 %vm165_vm2, %v645_v31  ;;  %v626_v39 = vpop.xlane.xlu1 %625 }
 0x41e   :  { %1295 = vmatmul.mubr.msk.bf16.vlgmr.msra.gmra.mrb[24].mxu0 %vm165_vm2, %v646_v32  ;;  %1299 = vmatpush3.bf16.msra.mxu1 %v850_v35  ;;  %1406 = vrcp.f32 %v626_v39 }
 0x41f   :  { %1305 = vmatpush3.bf16.msra.mxu0 %v898_v34  ;;  %1306 = vmatprep.mubr.msk.bf16.mxu0 %vm1514_vm0, %v1513_v0 }
 0x420   :  { %1316 = vmatprep.subr.bf16.mxu0 %v1513_v0  ;;  %1300 = vmatprep.mubr.msk.bf16.mxu1 %vm1514_vm0, %v1513_v0  ;;  %v1405_v36 = vpop.eup %1404 }
 0x421   :  { %1310 = vmatprep.subr.bf16.mxu1 %v1513_v0  ;;  %v640_v37 = vmul.f32 %v1405_v36, %v1719_v57  ;;  %v941_v47 = vpop.permute.xlu1 %940 }
 0x422   :  { %v946_v50 = vsel %vm656_vm3, %v941_v47, 0 }
 0x423   :  { %v648_v38 = vpack.c.bf16 %v640_v37, %v640_v37 }
 0x426   :  { %1307 = vmatmul.mubr.msk.bf16.vlgmr.msra.gmra.mrb[28].mxu0 %vm165_vm2, %v648_v38 }
 0x427   :  { %1318 = vmatprep.mubr.msk.bf16.mxu0 %vm1514_vm0, %v1513_v0 }
 0x428   :  { %v1407_v41 = vpop.eup %1406 }
 0x429   :  { %v642_v43 = vmul.f32 %v1407_v41, %v1723_v59 }
 0x42b   :  { %v650_v45 = vpack.c.bf16 %v642_v43, %v642_v43 }
 0x442   :  { %v617_v40 = vpop.xlane.xlu0 %616 }
 0x443   :  { %1408 = vrcp.f32 %v617_v40 }
 0x446   :  { %v623_v42 = vpop.xlane.xlu0 %622 }
 0x447   :  { %1410 = vrcp.f32 %v623_v42 }
 0x44a   :  { %v989_v20 = vpop.permute.xlu0 %988 }
 0x44b   :  { %v994_v21 = vsel %vm656_vm3, %v989_v20, 0  ;;  %v1176_v20 = vld [vmem:[%s1809_s4] ss:$0 sm:$0xff] }
 0x44c   :  { %1317 = vmatpush3.bf16.msra.mxu0 %v994_v21 }
 0x44d   :  { %v1409_v44 = vpop.eup %1408 }
 0x44e   :  { %v639_v46 = vmul.f32 %v1409_v44, %v1733_v6 }
 0x44f   :  { %1319 = vmatmul.mubr.msk.bf16.vlgmr.msra.gmra.mrb[32].mxu0 %vm165_vm2, %v650_v45 }
 0x450   :  { %v647_v48 = vpack.c.bf16 %v639_v46, %v639_v46 }
 0x451   :  { %v1411_v49 = vpop.eup %1410 }
 0x452   :  { %1301 = vmatmul.mubr.msk.bf16.vlgmr.msra.gmra.mrb[24].mxu1 %vm165_vm2, %v647_v48  ;;  %v641_v51 = vmul.f32 %v1411_v49, %v1737_v8  ;;  %v1378_v8 = vld [vmem:[#allocation7] sm:$0xff]  }
 0x453   :  { %1311 = vmatpush3.bf16.msra.mxu1 %v946_v50  ;;  %1312 = vmatprep.mubr.msk.bf16.mxu1 %vm1514_vm0, %v1513_v0 }
 0x454   :  { %1322 = vmatprep.subr.bf16.mxu1 %v1513_v0  ;;  %v649_v52 = vpack.c.bf16 %v641_v51, %v641_v51 }
 0x45a   :  { %1313 = vmatmul.mubr.msk.bf16.vlgmr.msra.gmra.mrb[28].mxu1 %vm165_vm2, %v649_v52 }
 0x45b   :  { %1326 = vmatprep.mubr.msk.bf16.mxu1 %vm1514_vm0, %v1513_v0  ;;  %1323 = vmatpush3.bf16.msra.mxu1 %v1378_v8 }
 0x45c   :  { %1324 = vmatprep.subr.bf16.mxu1 %v1513_v0 }
 0x45f   :  { %1325 = vmatpush3.bf16.msra.mxu1 %v1379_v14 }
 0x497   :  { %v694_v53 = vpop.f32.mrb[16].mxu1 }
 0x498   :  { %v742_v29 = vpop.f32.mrb[20].mxu0  ;;  %v1278_v54 = vpop.f32.mrb[17].mxu1 }
 0x499   :  { %v1284_v55 = vpop.f32.mrb[21].mxu0  ;;  %v697_v56 = vpop.f32.mrb[18].mxu1 }
 0x49a   :  { %v745_v57 = vpop.f32.mrb[22].mxu0  ;;  %v1279_v58 = vpop.f32.mrb[19].mxu1 }
 0x49b   :  { %v1285_v59 = vpop.f32.mrb[23].mxu0 }
 0x4f0   :  { %v790_v60 = vpop.f32.mrb[20].mxu1 }
 0x4f1   :  { %v838_v61 = vpop.f32.mrb[24].mxu0  ;;  %v1290_v62 = vpop.f32.mrb[21].mxu1 }
 0x4f2   :  { %v1361_v63 = vpack.i.bf16 %v838_v61, %v790_v60  ;;  %v1296_v1 = vpop.f32.mrb[25].mxu0  ;;  %v793_v2 = vpop.f32.mrb[22].mxu1 }
 0x4f3   :  { %v841_v3 = vpop.f32.mrb[26].mxu0  ;;  %v1291_v4 = vpop.f32.mrb[23].mxu1 }
 0x4f4   :  { %1362 = vrot.lane.b32.xlu1 %v1361_v63, %s1511_s17  ;;  %v1297_v5 = vpop.f32.mrb[27].mxu0 }
 0x4f9   :  { %v934_v6 = vpop.f32.mrb[28].mxu0 }
 0x4fa   :  { %v1308_v7 = vpop.f32.mrb[29].mxu0 }
 0x4fb   :  { %v937_v9 = vpop.f32.mrb[30].mxu0 }
 0x4fc   :  { %v1309_v28 = vpop.f32.mrb[31].mxu0 }
 0x522   :  { %v1030_v33 = vpop.f32.mrb[32].mxu0 }
 0x523   :  { %v1320_v10 = vpop.f32.mrb[33].mxu0 }
 0x524   :  { %v1033_v11 = vpop.f32.mrb[34].mxu0 }
 0x525   :  { %v886_v12 = vpop.f32.mrb[24].mxu1  ;;  %v1321_v13 = vpop.f32.mrb[35].mxu0 }
 0x526   :  { %v1366_v15 = vpack.i.bf16 %v934_v6, %v886_v12  ;;  %v1302_v16 = vpop.f32.mrb[25].mxu1 }
 0x527   :  { %v889_v17 = vpop.f32.mrb[26].mxu1 }
 0x528   :  { %v1303_v18 = vpop.f32.mrb[27].mxu1  ;;  %1367 = vrot.lane.b32.xlu0 %v1366_v15, %s1519_s2 }
 0x52d   :  { %v982_v19 = vpop.f32.mrb[28].mxu1 }
 0x52e   :  { %v1371_v22 = vpack.i.bf16 %v1030_v33, %v982_v19  ;;  %v1314_v23 = vpop.f32.mrb[29].mxu1 }
 0x52f   :  { %v985_v24 = vpop.f32.mrb[30].mxu1 }
 0x530   :  { %v1315_v25 = vpop.f32.mrb[31].mxu1  ;;  %1372 = vrot.lane.b32.xlu1 %v1371_v22, %s1520_s28 }
 0x566   :  { %v1363_v0 = vpop.permute.xlu1 %1362 }
 0x567   :  { %v1365_v27 = vunpack.i.h.bf16 %v1363_v0  ;;  %v1364_v30 = vunpack.i.l.bf16 %v1363_v0 }
 0x569   :  { %v1061_v34 = vsel %vm165_vm2, %v742_v29, %v1365_v27  ;;  %v1060_v36 = vsel %vm165_vm2, %v694_v53, %v1364_v30 }
 0x59a   :  { %v1368_v26 = vpop.permute.xlu0 %1367 }
 0x59b   :  { %v1370_v31 = vunpack.i.h.bf16 %v1368_v26  ;;  %v1369_v32 = vunpack.i.l.bf16 %v1368_v26 }
 0x59d   :  { %v1064_v39 = vsel %vm1062_vm4, %v1061_v34, %v1370_v31  ;;  %v1063_v40 = vsel %vm1062_vm4, %v1060_v36, %v1369_v32 }
 0x5a2   :  { %v1373_v35 = vpop.permute.xlu1 %1372 }
 0x5a3   :  { %v1375_v37 = vunpack.i.h.bf16 %v1373_v35  ;;  %v1374_v38 = vunpack.i.l.bf16 %v1373_v35 }
 0x5a5   :  { %v1067_v41 = vsel %vm1065_vm5, %v1064_v39, %v1375_v37  ;;  %v1066_v42 = vsel %vm1065_vm5, %v1063_v40, %v1374_v38 }
 0x5a6   :  { %v1068_v43 = vpack.c.bf16 %v1067_v41, %v1066_v42 }
 0x5a8   :  { %1327 = vmatmul.mubr.msk.bf16.vlgmr.msra.gmra.mrb[32].mxu1 %vm89_vm1, %v1068_v43 }
 0x67b   :  { %v1129_v21 = vpop.f32.mrb[32].mxu1 }
 0x67c   :  { %v1130_v44 = vadd.f32 %v1176_v20, %v1129_v21  ;;  %v1328_v45 = vpop.f32.mrb[33].mxu1 }
 0x67d   :  { %v1132_v46 = vpop.f32.mrb[34].mxu1 }
 0x67e   :  { %1136 = vst [vmem:[#allocation8] sm:$0xff] %v1130_v44  ;;  %v1133_v47 = vadd.f32 %v1176_v20, %v1132_v46  ;;  %v1329_v48 = vpop.f32.mrb[35].mxu1 }
 0x680   :  { %1137 = vst [vmem:[#allocation8 + $0x8] sm:$0xff] %v1133_v47 }
 0x681   :  { %1489 = shalt.err (!%p1486_p0)
}
 0x682   :  { %s1490_s19 = scalar_lea.hbm %s1810_s5, 256 }
 0x683   :  { %p1491_p1 = scmp.ne.s32.totalorder %s1810_s5, %s1490_s19  ;;  %p1494_p2 = scmp.lt.u32.totalorder %s1490_s19, %s1810_s5 }
 0x685   :  { %p1496_p3 = pnand %p1494_p2, %p1491_p1 }
 0x687   :  { %1499 = shalt.err (!%p1496_p3)
}
 0x688   :  { %1149 = dma.vmem_to_hbm [thread:$0]  %s1144_s15, 256, %s1810_s5, [#allocation4], %s1510_s1, %s1510_s1, %s1511_s17  }
 0x689   :  { %1504 = dma.done.wait [#allocation4], 256  }
 0x68a   :  { %1505 = vsyncadd [#allocation4], 4294967040 }
 0x68b   :  { %1153 = vsyncpa [#allocation3], 1 }
 0x68c   :  { %1154 = vsyncpa [#allocation6], 1 }
 0x68d   :  { %1155 = vsyncpa [#allocation4], 1 }

</bundles_post_ra>
